<compile_context>
chip_gen: v5e
topology: v5e:2x2
jax: 0.10.0
libtpu: 0.0.40
codegen_flags: <defaults>
</compile_context>

<pallas_src>
import jax
import jax.numpy as jnp
import numpy as np
from jax import lax
from jax.experimental import pallas as pl
from jax.experimental.pallas import tpu as pltpu


def _round_up(x, m):
    return ((x + m - 1) // m) * m


def _decoder_kernel(z_ref, t_ref,
                    w1z_ref, w1t_ref, b1_ref,
                    w2_ref, b2_ref,
                    w3t_ref, b3_ref,
                    out_ref):
    # Layer 1 without a concat: split-weight matmuls  (== concat(z, t) @ w1)
    h = jnp.dot(z_ref[...], w1z_ref[...], preferred_element_type=jnp.float32)
    h = h + jnp.dot(t_ref[...], w1t_ref[...], preferred_element_type=jnp.float32)
    h = jnp.maximum(h + b1_ref[...], 0.0)

    # Layer 2
    h = jnp.dot(h, w2_ref[...], preferred_element_type=jnp.float32) + b2_ref[...]
    h = jnp.maximum(h, 0.0)

    # Layer 3, computed transposed: (out_f=2, row_tile) -> lane-dense output tile.
    #   out_t[o, r] = sum_k w3t[o, k] * h[r, k]      (A @ B.T form)
    out_t = lax.dot_general(
        w3t_ref[...], h,
        dimension_numbers=(((1,), (1,)), ((), ())),
        preferred_element_type=jnp.float32) + b3_ref[...]

    # row 0 = mu, row 1 = sigma = 0.1 + 0.9 * softplus(log_sigma)
    # softplus is evaluated on the whole (2, row_tile) tile (EUP work is free here),
    # then a row select picks mu vs sigma — no width-1 intermediate slices.
    sig = 0.1 + 0.9 * jax.nn.softplus(out_t)
    row_idx = lax.broadcasted_iota(jnp.int32, out_t.shape, 0)
    out_ref[...] = jnp.where(row_idx == 0, out_t, sig).astype(out_ref.dtype)


def decoder_forward(z, target, params, *, row_tile=1024):
    """z: (B, T, h_size) f32, target: (B, T, in_features_x) f32.

    Returns (mu, sigma) each of shape (B, T, 1), matching the PyTorch Decoder.
    """
    B, T, H = z.shape
    _, _, Dx = target.shape
    rows = B * T

    w1, b1, w2, b2, w3, b3 = params
    hid = w1.shape[1]
    out_f = w3.shape[1]  # == 2

    # One-time (XLA-side) weight prep: split w1, transpose w3, bias as column.
    w1z = w1[:H]                 # (H, hid)
    w1t = w1[H:]                 # (Dx, hid)
    w3t = w3.T                   # (out_f, hid)
    b3c = b3.reshape(out_f, 1)   # (out_f, 1)

    # Tile sizing: large, 128-aligned row tiles (lane-dense output), padded rows.
    row_tile = max(128, min(row_tile, _round_up(rows, 128)))
    rows_padded = _round_up(rows, row_tile)

    z2 = z.reshape(rows, H)
    t2 = target.reshape(rows, Dx)
    pad = rows_padded - rows
    if pad:
        z2 = jnp.pad(z2, ((0, pad), (0, 0)))
        t2 = jnp.pad(t2, ((0, pad), (0, 0)))

    grid = (rows_padded // row_tile,)

    out = pl.pallas_call(
        _decoder_kernel,
        out_shape=jax.ShapeDtypeStruct((out_f, rows_padded), jnp.float32),
        grid_spec=pltpu.PrefetchScalarGridSpec(
            num_scalar_prefetch=0,
            grid=grid,
            in_specs=[
                pl.BlockSpec((row_tile, H), lambda i: (i, 0)),    # z rows tile
                pl.BlockSpec((row_tile, Dx), lambda i: (i, 0)),   # target rows tile
                pl.BlockSpec((H, hid), lambda i: (0, 0)),         # w1[:H]   (resident)
                pl.BlockSpec((Dx, hid), lambda i: (0, 0)),        # w1[H:]   (resident)
                pl.BlockSpec((1, hid), lambda i: (0, 0)),         # b1       (resident)
                pl.BlockSpec((hid, hid), lambda i: (0, 0)),       # w2       (resident)
                pl.BlockSpec((1, hid), lambda i: (0, 0)),         # b2       (resident)
                pl.BlockSpec((out_f, hid), lambda i: (0, 0)),     # w3.T     (resident)
                pl.BlockSpec((out_f, 1), lambda i: (0, 0)),       # b3 col   (resident)
            ],
            out_specs=pl.BlockSpec((out_f, row_tile), lambda i: (0, i)),  # lane-dense
        ),
        compiler_params=pltpu.CompilerParams(
            dimension_semantics=("parallel",)),
    )(z2, t2, w1z, w1t, b1, w2, b2, w3t, b3c)

    out = out[:, :rows]                      # drop padded rows
    mu = out[0].reshape(B, T, 1)
    sigma = out[1].reshape(B, T, 1)
    return mu, sigma


def init_params(key, in_features_x, h_size, hidden, out_features=2):
    """Deterministic synthetic init of the 3-layer MLP (Linear weights stored as (in, out))."""
    d_in = in_features_x + h_size
    k1, k2, k3 = jax.random.split(key, 3)
    w1 = jax.random.normal(k1, (d_in, hidden), jnp.float32) * (1.0 / np.sqrt(d_in))
    b1 = jnp.zeros((1, hidden), jnp.float32)
    w2 = jax.random.normal(k2, (hidden, hidden), jnp.float32) * (1.0 / np.sqrt(hidden))
    b2 = jnp.zeros((1, hidden), jnp.float32)
    w3 = jax.random.normal(k3, (hidden, out_features), jnp.float32) * (1.0 / np.sqrt(hidden))
    b3 = jnp.zeros((1, out_features), jnp.float32)
    return (w1, b1, w2, b2, w3, b3)


def decoder_reference(z, target, params):
    """Pure-JAX reference for correctness checking."""
    w1, b1, w2, b2, w3, b3 = params
    data = jnp.concatenate([z, target], axis=-1)
    h = jnp.maximum(data @ w1 + b1, 0.0)
    h = jnp.maximum(h @ w2 + b2, 0.0)
    out = h @ w3 + b3
    mu = out[..., 0:1]
    log_sigma = out[..., 1:2]
    sigma = 0.1 + 0.9 * jax.nn.softplus(log_sigma)
    return mu, sigma


if __name__ == "__main__":
    # Small shapes consistent with the module's forward:
    #   z:      (batch=2, seq=8, h_size=32)
    #   target: (batch=2, seq=8, in_features_x=4)
    B, T = 2, 8
    in_features_x, h_size, hidden = 4, 32, 32

    key = jax.random.PRNGKey(0)
    kz, kt, kp = jax.random.split(key, 3)
    z = jax.random.normal(kz, (B, T, h_size), jnp.float32)
    target = jax.random.normal(kt, (B, T, in_features_x), jnp.float32)
    params = init_params(kp, in_features_x, h_size, hidden)

    mu, sigma = decoder_forward(z, target, params)
    jax.block_until_ready((mu, sigma))

    mu_ref, sigma_ref = decoder_reference(z, target, params)
    np.testing.assert_allclose(np.asarray(mu), np.asarray(mu_ref), rtol=1e-5, atol=1e-5)
    np.testing.assert_allclose(np.asarray(sigma), np.asarray(sigma_ref), rtol=1e-5, atol=1e-5)
    assert bool(jnp.all(sigma > 0.1 - 1e-6))  # sigma lower bound from 0.1 + 0.9*softplus

    print("KERNEL_OK")
</pallas_src>

<mosaic_0001>
module attributes {stable_mosaic.version = 11 : i64} {
  func.func @_decoder_kernel(%arg0: i32, %arg1: memref<128x32xf32, #tpu.memory_space<vmem>>, %arg2: memref<128x4xf32, #tpu.memory_space<vmem>>, %arg3: memref<32x32xf32, #tpu.memory_space<vmem>>, %arg4: memref<4x32xf32, #tpu.memory_space<vmem>>, %arg5: memref<1x32xf32, #tpu.memory_space<vmem>>, %arg6: memref<32x32xf32, #tpu.memory_space<vmem>>, %arg7: memref<1x32xf32, #tpu.memory_space<vmem>>, %arg8: memref<2x32xf32, #tpu.memory_space<vmem>>, %arg9: memref<2x1xf32, #tpu.memory_space<vmem>>, %arg10: memref<2x128xf32, #tpu.memory_space<vmem>>) attributes {dimension_semantics = [#tpu.dimension_semantics<parallel>], iteration_bounds = array<i64: 1>, scalar_prefetch = 0 : i64, scratch_operands = 0 : i64, tpu.core_type = #tpu.core_type<tc>, window_params = [{transform_indices = @transform_0, window_bounds = array<i64: 128, 32>}, {transform_indices = @transform_1, window_bounds = array<i64: 128, 4>}, {pipeline_mode = #tpu.pipeline_mode<synchronous>, transform_indices = @transform_2, window_bounds = array<i64: 32, 32>}, {pipeline_mode = #tpu.pipeline_mode<synchronous>, transform_indices = @transform_3, window_bounds = array<i64: 4, 32>}, {pipeline_mode = #tpu.pipeline_mode<synchronous>, transform_indices = @transform_4, window_bounds = array<i64: 1, 32>}, {pipeline_mode = #tpu.pipeline_mode<synchronous>, transform_indices = @transform_5, window_bounds = array<i64: 32, 32>}, {pipeline_mode = #tpu.pipeline_mode<synchronous>, transform_indices = @transform_6, window_bounds = array<i64: 1, 32>}, {pipeline_mode = #tpu.pipeline_mode<synchronous>, transform_indices = @transform_7, window_bounds = array<i64: 2, 32>}, {pipeline_mode = #tpu.pipeline_mode<synchronous>, transform_indices = @transform_8, window_bounds = array<i64: 2, 1>}, {transform_indices = @transform_9, window_bounds = array<i64: 2, 128>}]} {
    %c0 = arith.constant 0 : index
    %c0_0 = arith.constant 0 : index
    %0 = vector.load %arg1[%c0, %c0_0] : memref<128x32xf32, #tpu.memory_space<vmem>>, vector<128x32xf32>
    %c0_1 = arith.constant 0 : index
    %c0_2 = arith.constant 0 : index
    %1 = vector.load %arg3[%c0_1, %c0_2] : memref<32x32xf32, #tpu.memory_space<vmem>>, vector<32x32xf32>
    %cst = arith.constant dense<0.000000e+00> : vector<128x32xf32>
    %2 = tpu.matmul %0, %1, %cst {dimension_numbers = #tpu.dot_dimension_numbers<[1], [0], [0], [1], [0, 0, 1, 1], [], []>} : vector<128x32xf32>, vector<32x32xf32>, vector<128x32xf32> -> vector<128x32xf32>
    %c0_3 = arith.constant 0 : index
    %c0_4 = arith.constant 0 : index
    %3 = vector.load %arg2[%c0_3, %c0_4] : memref<128x4xf32, #tpu.memory_space<vmem>>, vector<128x4xf32>
    %c0_5 = arith.constant 0 : index
    %c0_6 = arith.constant 0 : index
    %4 = vector.load %arg4[%c0_5, %c0_6] : memref<4x32xf32, #tpu.memory_space<vmem>>, vector<4x32xf32>
    %cst_7 = arith.constant dense<0.000000e+00> : vector<128x32xf32>
    %5 = tpu.matmul %3, %4, %cst_7 {dimension_numbers = #tpu.dot_dimension_numbers<[1], [0], [0], [1], [0, 0, 1, 1], [], []>} : vector<128x4xf32>, vector<4x32xf32>, vector<128x32xf32> -> vector<128x32xf32>
    %6 = arith.addf %2, %5 : vector<128x32xf32>
    %c0_8 = arith.constant 0 : index
    %c0_9 = arith.constant 0 : index
    %7 = vector.load %arg5[%c0_8, %c0_9] : memref<1x32xf32, #tpu.memory_space<vmem>>, vector<1x32xf32>
    %8 = vector.broadcast %7 : vector<1x32xf32> to vector<128x32xf32>
    %9 = arith.addf %6, %8 : vector<128x32xf32>
    %cst_10 = arith.constant 0.000000e+00 : f32
    %10 = vector.broadcast %cst_10 : f32 to vector<128x32xf32>
    %11 = arith.maximumf %9, %10 : vector<128x32xf32>
    %c0_11 = arith.constant 0 : index
    %c0_12 = arith.constant 0 : index
    %12 = vector.load %arg6[%c0_11, %c0_12] : memref<32x32xf32, #tpu.memory_space<vmem>>, vector<32x32xf32>
    %cst_13 = arith.constant dense<0.000000e+00> : vector<128x32xf32>
    %13 = tpu.matmul %11, %12, %cst_13 {dimension_numbers = #tpu.dot_dimension_numbers<[1], [0], [0], [1], [0, 0, 1, 1], [], []>} : vector<128x32xf32>, vector<32x32xf32>, vector<128x32xf32> -> vector<128x32xf32>
    %c0_14 = arith.constant 0 : index
    %c0_15 = arith.constant 0 : index
    %14 = vector.load %arg7[%c0_14, %c0_15] : memref<1x32xf32, #tpu.memory_space<vmem>>, vector<1x32xf32>
    %15 = vector.broadcast %14 : vector<1x32xf32> to vector<128x32xf32>
    %16 = arith.addf %13, %15 : vector<128x32xf32>
    %cst_16 = arith.constant 0.000000e+00 : f32
    %17 = vector.broadcast %cst_16 : f32 to vector<128x32xf32>
    %18 = arith.maximumf %16, %17 : vector<128x32xf32>
    %c0_17 = arith.constant 0 : index
    %c0_18 = arith.constant 0 : index
    %19 = vector.load %arg8[%c0_17, %c0_18] : memref<2x32xf32, #tpu.memory_space<vmem>>, vector<2x32xf32>
    %cst_19 = arith.constant dense<0.000000e+00> : vector<2x128xf32>
    %20 = tpu.matmul %19, %18, %cst_19 {dimension_numbers = #tpu.dot_dimension_numbers<[1], [1], [0], [0], [0, 0, 1, 0], [], []>} : vector<2x32xf32>, vector<128x32xf32>, vector<2x128xf32> -> vector<2x128xf32>
    %c0_20 = arith.constant 0 : index
    %c0_21 = arith.constant 0 : index
    %21 = vector.load %arg9[%c0_20, %c0_21] : memref<2x1xf32, #tpu.memory_space<vmem>>, vector<2x1xf32>
    %22 = vector.broadcast %21 : vector<2x1xf32> to vector<2x128xf32>
    %23 = arith.addf %20, %22 : vector<2x128xf32>
    %cst_22 = arith.constant 0.000000e+00 : f32
    %24 = vector.broadcast %cst_22 : f32 to vector<2x128xf32>
    %25 = arith.maximumf %23, %24 : vector<2x128xf32>
    %26 = vector.broadcast %cst_22 : f32 to vector<2x128xf32>
    %27 = arith.subf %23, %26 : vector<2x128xf32>
    %28 = arith.cmpf one, %27, %27 : vector<2x128xf32>
    %29 = vector.broadcast %cst_22 : f32 to vector<2x128xf32>
    %30 = arith.addf %23, %29 : vector<2x128xf32>
    %31 = math.absf %27 : vector<2x128xf32>
    %cst_23 = arith.constant 0.000000e+00 : f32
    %32 = vector.broadcast %cst_23 : f32 to vector<2x128xf32>
    %33 = arith.subf %32, %31 : vector<2x128xf32>
    %34 = math.exp %33 : vector<2x128xf32>
    %35 = math.log1p %34 : vector<2x128xf32>
    %36 = arith.addf %25, %35 : vector<2x128xf32>
    %37 = arith.select %28, %30, %36 : vector<2x128xi1>, vector<2x128xf32>
    %cst_24 = arith.constant 0.899999976 : f32
    %38 = vector.broadcast %cst_24 : f32 to vector<2x128xf32>
    %39 = arith.mulf %38, %37 : vector<2x128xf32>
    %cst_25 = arith.constant 1.000000e-01 : f32
    %40 = vector.broadcast %cst_25 : f32 to vector<2x128xf32>
    %41 = arith.addf %40, %39 : vector<2x128xf32>
    %42 = tpu.iota {dimensions = array<i32: 0>} : vector<2x128xi32>
    %c0_i32 = arith.constant 0 : i32
    %43 = vector.broadcast %c0_i32 : i32 to vector<2x128xi32>
    %44 = arith.cmpi eq, %42, %43 : vector<2x128xi32>
    %45 = arith.select %44, %23, %41 : vector<2x128xi1>, vector<2x128xf32>
    %c0_26 = arith.constant 0 : index
    %c0_27 = arith.constant 0 : index
    %46 = vector.load %arg10[%c0_26, %c0_27] : memref<2x128xf32, #tpu.memory_space<vmem>>, vector<2x128xf32>
    tpu.vector_store %arg10[%c0_26, %c0_27], %45 {strides = array<i32>} : memref<2x128xf32, #tpu.memory_space<vmem>>, vector<2x128xf32>,
    return
  }
  func.func @transform_0(%arg0: i32) -> (i32, i32) {
    %c0_i32 = arith.constant 0 : i32
    %c0_i32_0 = arith.constant 0 : i32
    return %arg0, %c0_i32 : i32, i32
  }
  func.func @transform_1(%arg0: i32) -> (i32, i32) {
    %c0_i32 = arith.constant 0 : i32
    %c0_i32_0 = arith.constant 0 : i32
    return %arg0, %c0_i32 : i32, i32
  }
  func.func @transform_2(%arg0: i32) -> (i32, i32) {
    %c0_i32 = arith.constant 0 : i32
    %c0_i32_0 = arith.constant 0 : i32
    %c0_i32_1 = arith.constant 0 : i32
    return %c0_i32, %c0_i32_0 : i32, i32
  }
  func.func @transform_3(%arg0: i32) -> (i32, i32) {
    %c0_i32 = arith.constant 0 : i32
    %c0_i32_0 = arith.constant 0 : i32
    %c0_i32_1 = arith.constant 0 : i32
    return %c0_i32, %c0_i32_0 : i32, i32
  }
  func.func @transform_4(%arg0: i32) -> (i32, i32) {
    %c0_i32 = arith.constant 0 : i32
    %c0_i32_0 = arith.constant 0 : i32
    %c0_i32_1 = arith.constant 0 : i32
    return %c0_i32, %c0_i32_0 : i32, i32
  }
  func.func @transform_5(%arg0: i32) -> (i32, i32) {
    %c0_i32 = arith.constant 0 : i32
    %c0_i32_0 = arith.constant 0 : i32
    %c0_i32_1 = arith.constant 0 : i32
    return %c0_i32, %c0_i32_0 : i32, i32
  }
  func.func @transform_6(%arg0: i32) -> (i32, i32) {
    %c0_i32 = arith.constant 0 : i32
    %c0_i32_0 = arith.constant 0 : i32
    %c0_i32_1 = arith.constant 0 : i32
    return %c0_i32, %c0_i32_0 : i32, i32
  }
  func.func @transform_7(%arg0: i32) -> (i32, i32) {
    %c0_i32 = arith.constant 0 : i32
    %c0_i32_0 = arith.constant 0 : i32
    %c0_i32_1 = arith.constant 0 : i32
    return %c0_i32, %c0_i32_0 : i32, i32
  }
  func.func @transform_8(%arg0: i32) -> (i32, i32) {
    %c0_i32 = arith.constant 0 : i32
    %c0_i32_0 = arith.constant 0 : i32
    %c0_i32_1 = arith.constant 0 : i32
    return %c0_i32, %c0_i32_0 : i32, i32
  }
  func.func @transform_9(%arg0: i32) -> (i32, i32) {
    %c0_i32 = arith.constant 0 : i32
    %c0_i32_0 = arith.constant 0 : i32
    return %c0_i32, %arg0 : i32, i32
  }
}

</mosaic_0001>

<bundles_post_ra>
// kernel: tpu_custom_call.1
= control target key start
LH: loop header
LB: loop body
LE: loop exit
PB: predicated region body
PF: predicated region fallthrough
CT: control target
= control target key end

     0   :  { %vm119_vm0 = vcmask 1043456   ;;  %vm70_vm1 = vcmask 31744   ;;  %vm188_vm2 = vcmask 261120   ;;  %s971_s0 = inlined_call_operand.vmem [shape: f32[128,32], index: 0, kind: input, shape index: {}]   ;;  %s972_s1 = inlined_call_operand.vmem [shape: f32[128,4], index: 1, kind: input, shape index: {}]   ;;  %s973_s2 = inlined_call_operand.vmem [shape: f32[32,32], index: 2, kind: input, shape index: {}]   ;;  %s974_s3 = inlined_call_operand.vmem [shape: f32[4,32], index: 3, kind: input, shape index: {}]   ;;  %s975_s4 = inlined_call_operand.vmem [shape: f32[1,32], index: 4, kind: input, shape index: {}]   ;;  %s976_s5 = inlined_call_operand.vmem [shape: f32[32,32], index: 5, kind: input, shape index: {}]   ;;  %s977_s6 = inlined_call_operand.vmem [shape: f32[1,32], index: 6, kind: input, shape index: {}]   ;;  %s978_s7 = inlined_call_operand.vmem [shape: f32[2,32], index: 7, kind: input, shape index: {}]   ;;  %s979_s8 = inlined_call_operand.vmem [shape: f32[2,1], index: 8, kind: input, shape index: {}]   ;;  %s980_s9 = inlined_call_operand.hbm [shape: f32[2,128], index: 9, kind: output, shape index: {}]  }
   0x1   :  { %v52_v0 = vld [vmem:[%s973_s2 + $0x18] sm:$0xff]  ;;  %v51_v1 = vld [vmem:[%s973_s2 + $0x10] sm:$0xff]  ;;  %v69_v2 = vld [vmem:[%s974_s3] sm:$0xf] }
   0x2   :  { %249 = vmatpush.msra.mxu1 %v52_v0  ;;  %v53_v3 = vld [vmem:[%s972_s1] sm:$0xff]  ;;  %v50_v4 = vld [vmem:[%s973_s2 + $0x8] sm:$0xff]  ;;  %594 = vmatpush.msk.msra.mxu0 %vm119_vm0, %v69_v2 }
   0x3   :  { %595 = vmatmul.msk.f32.vlgmr.msra.gmra.mxu0 %vm70_vm1, %v53_v3  ;;  %v49_v5 = vld [vmem:[%s973_s2] sm:$0xff] }
   0x4   :  { %250 = vmatpush.msra.mxu1 %v51_v1  ;;  %v33_v6 = vld [vmem:[%s971_s0] sm:$0xff] }
   0x6   :  { %251 = vmatpush.msra.mxu1 %v50_v4 }
   0x7   :  { %14 = vsyncpa [#allocation3], 0  ;;  %v54_v7 = vld [vmem:[%s972_s1 + $0x8] sm:$0xff]  ;;  %v55_v9 = vld [vmem:[%s972_s1 + $0x10] sm:$0xff]  ;;  %s585_s2 = sshll.u32 %s980_s9, 4  ;;  %s586_s2 = int_to_ptr.hbm [resolvable:$true] %s585_s2 }
   0x8   :  { %252 = vmatpush.msra.mxu1 %v49_v5  ;;  %v34_v8 = vld [vmem:[%s971_s0 + $0x8] sm:$0xff]  ;;  %v35_v10 = vld [vmem:[%s971_s0 + $0x10] sm:$0xff]  ;;  %v56_v11 = vld [vmem:[%s972_s1 + $0x18] sm:$0xff] }
   0x9   :  { %611 = vmatmul.msk.f32.vlgmr.msra.gmra.mxu1 %vm188_vm2, %v33_v6  ;;  %v36_v12 = vld [vmem:[%s971_s0 + $0x18] sm:$0xff]  ;;  %v57_v13 = vld [vmem:[%s972_s1 + $0x20] sm:$0xff]  ;;  %v58_v15 = vld [vmem:[%s972_s1 + $0x28] sm:$0xff] }
   0xa   :  { %v37_v14 = vld [vmem:[%s971_s0 + $0x20] sm:$0xff]  ;;  %v38_v16 = vld [vmem:[%s971_s0 + $0x28] sm:$0xff]  ;;  %v59_v17 = vld [vmem:[%s972_s1 + $0x30] sm:$0xff] }
   0xb   :  { %596 = vmatmul.msk.f32.gmra.mxu0 %vm70_vm1, %v54_v7  ;;  %v39_v18 = vld [vmem:[%s971_s0 + $0x30] sm:$0xff]  ;;  %v60_v19 = vld [vmem:[%s972_s1 + $0x38] sm:$0xff]  ;;  %v61_v21 = vld [vmem:[%s972_s1 + $0x40] sm:$0xff] }
   0xc   :  { %v40_v20 = vld [vmem:[%s971_s0 + $0x38] sm:$0xff]  ;;  %v41_v22 = vld [vmem:[%s971_s0 + $0x40] sm:$0xff]  ;;  %v62_v23 = vld [vmem:[%s972_s1 + $0x48] sm:$0xff] }
   0xd   :  { %v42_v24 = vld [vmem:[%s971_s0 + $0x48] sm:$0xff]  ;;  %v63_v25 = vld [vmem:[%s972_s1 + $0x50] sm:$0xff]  ;;  %v64_v27 = vld [vmem:[%s972_s1 + $0x58] sm:$0xff] }
   0xe   :  { %v43_v26 = vld [vmem:[%s971_s0 + $0x50] sm:$0xff]  ;;  %v44_v28 = vld [vmem:[%s971_s0 + $0x58] sm:$0xff]  ;;  %v65_v29 = vld [vmem:[%s972_s1 + $0x60] sm:$0xff] }
   0xf   :  { %v341_v30 = vld [vmem:[%s976_s5 + $0x18] sm:$0xff]  ;;  %v45_v31 = vld [vmem:[%s971_s0 + $0x60] sm:$0xff]  ;;  %v340_v32 = vld [vmem:[%s976_s5 + $0x10] sm:$0xff] }
  0x10   :  { %406 = vmatpush.msra.mxu2 %v341_v30  ;;  %v66_v33 = vld [vmem:[%s972_s1 + $0x68] sm:$0xff]  ;;  %v338_v35 = vld [vmem:[%s976_s5] sm:$0xff]  ;;  %v67_v37 = vld [vmem:[%s972_s1 + $0x70] sm:$0xff] }
  0x11   :  { %612 = vmatmul.msk.f32.gmra.mxu1 %vm188_vm2, %v34_v8  ;;  %v339_v34 = vld [vmem:[%s976_s5 + $0x8] sm:$0xff]  ;;  %v47_v38 = vld [vmem:[%s971_s0 + $0x70] sm:$0xff]  ;;  %v68_v39 = vld [vmem:[%s972_s1 + $0x78] sm:$0xff] }
  0x12   :  { %407 = vmatpush.msra.mxu2 %v340_v32  ;;  %v46_v36 = vld [vmem:[%s971_s0 + $0x68] sm:$0xff]  ;;  %v48_v40 = vld [vmem:[%s971_s0 + $0x78] sm:$0xff]  ;;  %v905_v42 = vld [vmem:[%s975_s4] ss:$0 sm:$0xff] }
  0x13   :  { %597 = vmatmul.msk.f32.gmra.mxu0 %vm70_vm1, %v55_v9 }
  0x14   :  { %408 = vmatpush.msra.mxu2 %v339_v34 }
  0x16   :  { %409 = vmatpush.msra.mxu2 %v338_v35 }
  0x19   :  { %613 = vmatmul.msk.f32.gmra.mxu1 %vm188_vm2, %v35_v10 }
  0x1b   :  { %598 = vmatmul.msk.f32.gmra.mxu0 %vm70_vm1, %v56_v11 }
  0x21   :  { %614 = vmatmul.msk.f32.gmra.mxu1 %vm188_vm2, %v36_v12 }
  0x23   :  { %599 = vmatmul.msk.f32.gmra.mxu0 %vm70_vm1, %v57_v13 }
  0x29   :  { %615 = vmatmul.msk.f32.gmra.mxu1 %vm188_vm2, %v37_v14 }
  0x2b   :  { %600 = vmatmul.msk.f32.gmra.mxu0 %vm70_vm1, %v58_v15 }
  0x31   :  { %616 = vmatmul.msk.f32.gmra.mxu1 %vm188_vm2, %v38_v16 }
  0x33   :  { %601 = vmatmul.msk.f32.gmra.mxu0 %vm70_vm1, %v59_v17 }
  0x39   :  { %617 = vmatmul.msk.f32.gmra.mxu1 %vm188_vm2, %v39_v18 }
  0x3b   :  { %602 = vmatmul.msk.f32.gmra.mxu0 %vm70_vm1, %v60_v19 }
  0x41   :  { %618 = vmatmul.msk.f32.gmra.mxu1 %vm188_vm2, %v40_v20 }
  0x43   :  { %603 = vmatmul.msk.f32.gmra.mxu0 %vm70_vm1, %v61_v21 }
  0x49   :  { %619 = vmatmul.msk.f32.gmra.mxu1 %vm188_vm2, %v41_v22 }
  0x4b   :  { %604 = vmatmul.msk.f32.gmra.mxu0 %vm70_vm1, %v62_v23 }
  0x51   :  { %620 = vmatmul.msk.f32.gmra.mxu1 %vm188_vm2, %v42_v24 }
  0x53   :  { %605 = vmatmul.msk.f32.gmra.mxu0 %vm70_vm1, %v63_v25 }
  0x59   :  { %621 = vmatmul.msk.f32.gmra.mxu1 %vm188_vm2, %v43_v26 }
  0x5b   :  { %606 = vmatmul.msk.f32.gmra.mxu0 %vm70_vm1, %v64_v27 }
  0x61   :  { %622 = vmatmul.msk.f32.gmra.mxu1 %vm188_vm2, %v44_v28 }
  0x63   :  { %607 = vmatmul.msk.f32.gmra.mxu0 %vm70_vm1, %v65_v29 }
  0x69   :  { %623 = vmatmul.msk.f32.gmra.mxu1 %vm188_vm2, %v45_v31 }
  0x6b   :  { %608 = vmatmul.msk.f32.gmra.mxu0 %vm70_vm1, %v66_v33 }
  0x71   :  { %624 = vmatmul.msk.f32.gmra.mxu1 %vm188_vm2, %v46_v36 }
  0x73   :  { %609 = vmatmul.msk.f32.gmra.mxu0 %vm70_vm1, %v67_v37 }
  0x79   :  { %625 = vmatmul.msk.f32.gmra.mxu1 %vm188_vm2, %v47_v38 }
  0x7b   :  { %610 = vmatmul.msk.f32.gmra.mxu0 %vm70_vm1, %v68_v39 }
  0x80   :  { %v140_v41 = vpop.f32.mrf.mxu0 }
  0x81   :  { %626 = vmatmul.msk.f32.gmra.mxu1 %vm188_vm2, %v48_v40 }
  0x86   :  { %v254_v43 = vpop.f32.mrf.mxu1 }
  0x87   :  { %v255_v44 = vadd.f32 %v254_v43, %v140_v41 }
  0x88   :  { %v143_v46 = vpop.f32.mrf.mxu0 }
  0x89   :  { %v306_v45 = vadd.f32 %v905_v42, %v255_v44 }
  0x8b   :  { %v322_v47 = vmax.f32 %v306_v45, 0.0 }
  0x8d   :  { %627 = vmatmul.msk.f32.vlgmr.msra.gmra.mxu2 %vm188_vm2, %v322_v47 }
  0x8e   :  { %v257_v48 = vpop.f32.mrf.mxu1 }
  0x8f   :  { %v258_v49 = vadd.f32 %v257_v48, %v143_v46 }
  0x90   :  { %v146_v51 = vpop.f32.mrf.mxu0 }
  0x91   :  { %v307_v50 = vadd.f32 %v905_v42, %v258_v49 }
  0x93   :  { %v323_v52 = vmax.f32 %v307_v50, 0.0 }
  0x95   :  { %628 = vmatmul.msk.f32.gmra.mxu2 %vm188_vm2, %v323_v52 }
  0x96   :  { %v260_v53 = vpop.f32.mrf.mxu1 }
  0x97   :  { %v261_v54 = vadd.f32 %v260_v53, %v146_v51 }
  0x98   :  { %v149_v56 = vpop.f32.mrf.mxu0 }
  0x99   :  { %v308_v55 = vadd.f32 %v905_v42, %v261_v54 }
  0x9b   :  { %v324_v57 = vmax.f32 %v308_v55, 0.0 }
  0x9d   :  { %629 = vmatmul.msk.f32.gmra.mxu2 %vm188_vm2, %v324_v57 }
  0x9e   :  { %v263_v58 = vpop.f32.mrf.mxu1 }
  0x9f   :  { %v264_v59 = vadd.f32 %v263_v58, %v149_v56 }
  0xa0   :  { %v152_v61 = vpop.f32.mrf.mxu0 }
  0xa1   :  { %v309_v60 = vadd.f32 %v905_v42, %v264_v59 }
  0xa3   :  { %v325_v62 = vmax.f32 %v309_v60, 0.0 }
  0xa5   :  { %630 = vmatmul.msk.f32.gmra.mxu2 %vm188_vm2, %v325_v62 }
  0xa6   :  { %v266_v63 = vpop.f32.mrf.mxu1 }
  0xa7   :  { %v267_v0 = vadd.f32 %v266_v63, %v152_v61 }
  0xa8   :  { %v155_v2 = vpop.f32.mrf.mxu0 }
  0xa9   :  { %v310_v1 = vadd.f32 %v905_v42, %v267_v0 }
  0xab   :  { %v326_v3 = vmax.f32 %v310_v1, 0.0 }
  0xad   :  { %631 = vmatmul.msk.f32.gmra.mxu2 %vm188_vm2, %v326_v3 }
  0xae   :  { %v269_v4 = vpop.f32.mrf.mxu1 }
  0xaf   :  { %v270_v5 = vadd.f32 %v269_v4, %v155_v2 }
  0xb0   :  { %v158_v7 = vpop.f32.mrf.mxu0 }
  0xb1   :  { %v311_v6 = vadd.f32 %v905_v42, %v270_v5 }
  0xb3   :  { %v327_v8 = vmax.f32 %v311_v6, 0.0 }
  0xb5   :  { %632 = vmatmul.msk.f32.gmra.mxu2 %vm188_vm2, %v327_v8 }
  0xb6   :  { %v272_v9 = vpop.f32.mrf.mxu1 }
  0xb7   :  { %v273_v10 = vadd.f32 %v272_v9, %v158_v7 }
  0xb8   :  { %v161_v12 = vpop.f32.mrf.mxu0 }
  0xb9   :  { %v312_v11 = vadd.f32 %v905_v42, %v273_v10 }
  0xbb   :  { %v328_v13 = vmax.f32 %v312_v11, 0.0 }
  0xbd   :  { %633 = vmatmul.msk.f32.gmra.mxu2 %vm188_vm2, %v328_v13 }
  0xbe   :  { %v275_v14 = vpop.f32.mrf.mxu1 }
  0xbf   :  { %v276_v15 = vadd.f32 %v275_v14, %v161_v12 }
  0xc0   :  { %v164_v17 = vpop.f32.mrf.mxu0 }
  0xc1   :  { %v313_v16 = vadd.f32 %v905_v42, %v276_v15 }
  0xc3   :  { %v329_v18 = vmax.f32 %v313_v16, 0.0 }
  0xc5   :  { %634 = vmatmul.msk.f32.gmra.mxu2 %vm188_vm2, %v329_v18 }
  0xc6   :  { %v278_v19 = vpop.f32.mrf.mxu1 }
  0xc7   :  { %v279_v20 = vadd.f32 %v278_v19, %v164_v17 }
  0xc8   :  { %v167_v22 = vpop.f32.mrf.mxu0 }
  0xc9   :  { %v314_v21 = vadd.f32 %v905_v42, %v279_v20 }
  0xcb   :  { %v330_v23 = vmax.f32 %v314_v21, 0.0 }
  0xcd   :  { %635 = vmatmul.msk.f32.gmra.mxu2 %vm188_vm2, %v330_v23 }
  0xce   :  { %v281_v24 = vpop.f32.mrf.mxu1 }
  0xcf   :  { %v282_v25 = vadd.f32 %v281_v24, %v167_v22 }
  0xd0   :  { %v170_v27 = vpop.f32.mrf.mxu0 }
  0xd1   :  { %v315_v26 = vadd.f32 %v905_v42, %v282_v25 }
  0xd3   :  { %v331_v28 = vmax.f32 %v315_v26, 0.0 }
  0xd5   :  { %636 = vmatmul.msk.f32.gmra.mxu2 %vm188_vm2, %v331_v28 }
  0xd6   :  { %v284_v29 = vpop.f32.mrf.mxu1 }
  0xd7   :  { %v285_v30 = vadd.f32 %v284_v29, %v170_v27 }
  0xd8   :  { %v173_v32 = vpop.f32.mrf.mxu0 }
  0xd9   :  { %v316_v31 = vadd.f32 %v905_v42, %v285_v30  ;;  %v476_v30 = vld [vmem:[%s979_s8] sm:$0x3] }
  0xdb   :  { %v332_v33 = vmax.f32 %v316_v31, 0.0  ;;  %v695_v31 = vmov 0  }
  0xdc   :  { %662 = vset.pattern.permute.xlu0 %v695_v31 }
  0xdd   :  { %637 = vmatmul.msk.f32.gmra.mxu2 %vm188_vm2, %v332_v33  ;;  %479 = vperm.xlu0 %662, %v476_v30  }
  0xde   :  { %v287_v34 = vpop.f32.mrf.mxu1 }
  0xdf   :  { %v288_v35 = vadd.f32 %v287_v34, %v173_v32 }
  0xe0   :  { %v176_v37 = vpop.f32.mrf.mxu0 }
  0xe1   :  { %v317_v36 = vadd.f32 %v905_v42, %v288_v35 }
  0xe3   :  { %v333_v38 = vmax.f32 %v317_v36, 0.0 }
  0xe5   :  { %638 = vmatmul.msk.f32.gmra.mxu2 %vm188_vm2, %v333_v38 }
  0xe6   :  { %v290_v39 = vpop.f32.mrf.mxu1 }
  0xe7   :  { %v291_v40 = vadd.f32 %v290_v39, %v176_v37 }
  0xe8   :  { %v179_v43 = vpop.f32.mrf.mxu0 }
  0xe9   :  { %v318_v41 = vadd.f32 %v905_v42, %v291_v40 }
  0xeb   :  { %v334_v44 = vmax.f32 %v318_v41, 0.0 }
  0xed   :  { %639 = vmatmul.msk.f32.gmra.mxu2 %vm188_vm2, %v334_v44 }
  0xee   :  { %v293_v45 = vpop.f32.mrf.mxu1 }
  0xef   :  { %v294_v46 = vadd.f32 %v293_v45, %v179_v43 }
  0xf0   :  { %v182_v48 = vpop.f32.mrf.mxu0 }
  0xf1   :  { %v319_v47 = vadd.f32 %v905_v42, %v294_v46  ;;  %v475_v46 = vld [vmem:[%s978_s7] sm:$0x3]  ;;  %s696_s7 = smov [#allocation2]  }
  0xf2   :  { %s583_s23 = sshll.u32 %s696_s7, 4  ;;  %s584_s23 = int_to_ptr.vmem [resolvable:$true] %s583_s23 }
  0xf3   :  { %v335_v49 = vmax.f32 %v319_v47, 0.0 }
  0xf5   :  { %640 = vmatmul.msk.f32.gmra.mxu2 %vm188_vm2, %v335_v49 }
  0xf6   :  { %v296_v50 = vpop.f32.mrf.mxu1 }
  0xf7   :  { %v297_v51 = vadd.f32 %v296_v50, %v182_v48 }
  0xf8   :  { %v185_v54 = vpop.f32.mrf.mxu0 }
  0xf9   :  { %v320_v52 = vadd.f32 %v905_v42, %v297_v51 }
  0xfb   :  { %v336_v53 = vmax.f32 %v320_v52, 0.0 }
  0xfd   :  { %641 = vmatmul.msk.f32.gmra.mxu2 %vm188_vm2, %v336_v53 }
  0xfe   :  { %v299_v55 = vpop.f32.mrf.mxu1 }
  0xff   :  { %v300_v56 = vadd.f32 %v299_v55, %v185_v54 }
 0x101   :  { %v321_v57 = vadd.f32 %v905_v42, %v300_v56  ;;  %v664_v42 = vld [vmem:[%s977_s6] ss:$0 sm:$0xff] }
 0x103   :  { %v337_v58 = vmax.f32 %v321_v57, 0.0 }
 0x105   :  { %642 = vmatmul.msk.f32.gmra.mxu2 %vm188_vm2, %v337_v58 }
 0x110   :  { %v939_v59 = vpop.f32.mrf.mxu2 }
 0x111   :  { %v412_v43 = vadd.f32 %v664_v42, %v939_v59  ;;  %v573_v59 = vlaneseq }
 0x113   :  { %v459_v45 = vmax.f32 %v412_v43, 0.0 }
 0x118   :  { %v414_v60 = vpop.f32.mrf.mxu2 }
 0x119   :  { %v415_v40 = vadd.f32 %v664_v42, %v414_v60 }
 0x11b   :  { %v460_v44 = vmax.f32 %v415_v40, 0.0 }
 0x120   :  { %v417_v61 = vpop.f32.mrf.mxu2 }
 0x121   :  { %v418_v38 = vadd.f32 %v664_v42, %v417_v61 }
 0x123   :  { %v461_v41 = vmax.f32 %v418_v38, 0.0 }
 0x128   :  { %v420_v62 = vpop.f32.mrf.mxu2 }
 0x129   :  { %v421_v36 = vadd.f32 %v664_v42, %v420_v62 }
 0x12b   :  { %v462_v39 = vmax.f32 %v421_v36, 0.0 }
 0x130   :  { %v423_v63 = vpop.f32.mrf.mxu2 }
 0x131   :  { %v424_v34 = vadd.f32 %v664_v42, %v423_v63 }
 0x133   :  { %v463_v37 = vmax.f32 %v424_v34, 0.0 }
 0x138   :  { %v426_v0 = vpop.f32.mrf.mxu2 }
 0x139   :  { %v427_v32 = vadd.f32 %v664_v42, %v426_v0 }
 0x13b   :  { %v464_v35 = vmax.f32 %v427_v32, 0.0 }
 0x140   :  { %v429_v1 = vpop.f32.mrf.mxu2 }
 0x141   :  { %v430_v28 = vadd.f32 %v664_v42, %v429_v1  ;;  %v574_v1 = vshrl.u32 %v573_v59, 7 }
 0x143   :  { %v465_v33 = vmax.f32 %v430_v28, 0.0  ;;  %vm575_vm5 = vcmp.eq.s32.totalorder %v574_v1, 0 }
 0x148   :  { %v432_v2 = vpop.f32.mrf.mxu2 }
 0x149   :  { %v433_v26 = vadd.f32 %v664_v42, %v432_v2 }
 0x14b   :  { %v466_v29 = vmax.f32 %v433_v26, 0.0 }
 0x14f   :  { %v480_v47 = vpop.permute.xlu0 %479 }
 0x150   :  { %v435_v3 = vpop.f32.mrf.mxu2 }
 0x151   :  { %v436_v24 = vadd.f32 %v664_v42, %v435_v3 }
 0x153   :  { %v467_v27 = vmax.f32 %v436_v24, 0.0 }
 0x158   :  { %v438_v4 = vpop.f32.mrf.mxu2 }
 0x159   :  { %v439_v22 = vadd.f32 %v664_v42, %v438_v4 }
 0x15b   :  { %v468_v25 = vmax.f32 %v439_v22, 0.0 }
 0x160   :  { %v441_v5 = vpop.f32.mrf.mxu2 }
 0x161   :  { %v442_v20 = vadd.f32 %v664_v42, %v441_v5 }
 0x163   :  { %v469_v23 = vmax.f32 %v442_v20, 0.0 }
 0x168   :  { %v444_v6 = vpop.f32.mrf.mxu2 }
 0x169   :  { %v445_v18 = vadd.f32 %v664_v42, %v444_v6 }
 0x16b   :  { %v470_v21 = vmax.f32 %v445_v18, 0.0 }
 0x170   :  { %v447_v7 = vpop.f32.mrf.mxu2 }
 0x171   :  { %v448_v16 = vadd.f32 %v664_v42, %v447_v7 }
 0x173   :  { %v471_v19 = vmax.f32 %v448_v16, 0.0 }
 0x178   :  { %v450_v8 = vpop.f32.mrf.mxu2 }
 0x179   :  { %v451_v14 = vadd.f32 %v664_v42, %v450_v8 }
 0x17b   :  { %v472_v17 = vmax.f32 %v451_v14, 0.0 }
 0x180   :  { %v453_v9 = vpop.f32.mrf.mxu2 }
 0x181   :  { %v454_v12 = vadd.f32 %v664_v42, %v453_v9 }
 0x183   :  { %v473_v15 = vmax.f32 %v454_v12, 0.0 }
 0x188   :  { %v456_v10 = vpop.f32.mrf.mxu2 }
 0x189   :  { %v457_v11 = vadd.f32 %v664_v42, %v456_v10 }
 0x18b   :  { %v474_v13 = vmax.f32 %v457_v11, 0.0 }
 0x18d   :  { %643 = vmatpush.xpose.msk.msra.mxu3 %vm188_vm2, %v474_v13 }
 0x191   :  { %644 = vmatpush.xpose.msk.msra.mxu3 %vm188_vm2, %v473_v15 }
 0x195   :  { %645 = vmatpush.xpose.msk.msra.mxu3 %vm188_vm2, %v472_v17 }
 0x199   :  { %646 = vmatpush.xpose.msk.msra.mxu3 %vm188_vm2, %v471_v19 }
 0x19d   :  { %647 = vmatpush.xpose.msk.msra.mxu3 %vm188_vm2, %v470_v21 }
 0x1a1   :  { %648 = vmatpush.xpose.msk.msra.mxu3 %vm188_vm2, %v469_v23 }
 0x1a5   :  { %649 = vmatpush.xpose.msk.msra.mxu3 %vm188_vm2, %v468_v25 }
 0x1a9   :  { %650 = vmatpush.xpose.msk.msra.mxu3 %vm188_vm2, %v467_v27 }
 0x1ad   :  { %651 = vmatpush.xpose.msk.msra.mxu3 %vm188_vm2, %v466_v29 }
 0x1b1   :  { %652 = vmatpush.xpose.msk.msra.mxu3 %vm188_vm2, %v465_v33 }
 0x1b5   :  { %653 = vmatpush.xpose.msk.msra.mxu3 %vm188_vm2, %v464_v35 }
 0x1b9   :  { %654 = vmatpush.xpose.msk.msra.mxu3 %vm188_vm2, %v463_v37 }
 0x1bd   :  { %655 = vmatpush.xpose.msk.msra.mxu3 %vm188_vm2, %v462_v39 }
 0x1c1   :  { %656 = vmatpush.xpose.msk.msra.mxu3 %vm188_vm2, %v461_v41 }
 0x1c5   :  { %657 = vmatpush.xpose.msk.msra.mxu3 %vm188_vm2, %v460_v44 }
 0x1c9   :  { %658 = vmatpush.xpose.msk.msra.mxu3 %vm188_vm2, %v459_v45 }
 0x1cc   :  { %659 = vmatmul.msk.f32.vlgmr.msra.gmra.mxu3 %vm188_vm2, %v475_v46 }
 0x24f   :  { %v550_v48 = vpop.f32.mrf.mxu3 }
 0x250   :  { %v551_v49 = vadd.f32 %v550_v48, %v480_v47 }
 0x252   :  { %v556_v50 = vand.u32 2147483647, %v551_v49  ;;  %v553_v62 = vmax.f32 %v551_v49, 0.0  ;;  %vm554_vm4 = vcmp.ne.f32.partialorder %v551_v49, %v551_v49 }
 0x254   :  { %v557_v51 = vsub.f32 0.0, %v556_v50 }
 0x256   :  { %v558_v52 = vmul.f32 1.442695, %v557_v51 }
 0x258   :  { %665 = vpow2.f32 %v558_v52 }
 0x25e   :  { %v666_v53 = vpop.eup %665 }
 0x25f   :  { %v560_v54 = vadd.f32 1.0, %v666_v53  ;;  %v563_v55 = vmul.f32 -0.5, %v666_v53  ;;  %v566_v57 = vand.u32 2147483647, %v666_v53 }
 0x261   :  { %667 = vlog2.f32 %v560_v54  ;;  %v564_v56 = vadd.f32 1.0, %v563_v55  ;;  %vm567_vm3 = vcmp.lt.f32.partialorder %v566_v57, 0.0004427343 }
 0x263   :  { %v565_v61 = vmul.f32 %v666_v53, %v564_v56 }
 0x267   :  { %v668_v58 = vpop.eup %667 }
 0x268   :  { %v562_v60 = vmul.f32 0.6931472, %v668_v58 }
 0x26a   :  { %v568_v63 = vsel %vm567_vm3, %v565_v61, %v562_v60 }
 0x26b   :  { %v569_v0 = vadd.f32 %v568_v63, %v553_v62 }
 0x26d   :  { %v570_v2 = vsel %vm554_vm4, %v551_v49, %v569_v0 }
 0x26e   :  { %v571_v3 = vmul.f32 0.9, %v570_v2 }
 0x270   :  { %v572_v4 = vadd.f32 0.1, %v571_v3 }
 0x272   :  { %v576_v5 = vsel %vm575_vm5, %v551_v49, %v572_v4 }
 0x273   :  { %577 = vst [vmem:[#allocation2] sm:$0x3] %v576_v5 }
 0x274   :  { %588 = dma.vmem_to_hbm [thread:$0]  %s584_s23, 32, %s586_s2, [#allocation3]  }
 0x275   :  { %693 = dma.done.wait [#allocation3], 32  }
 0x276   :  { %694 = vsyncadd [#allocation3], 4294967264 }
 0x277   :  { %593 = vsyncpa [#allocation3], 1 }

</bundles_post_ra>
